<compile_context>
chip_gen: v7x
topology: tpu7x:2x2x1
jax: 0.10.0
libtpu: 0.0.40
codegen_flags: <defaults>
</compile_context>

<pallas_src>
import jax
import jax.numpy as jnp
from jax.experimental import pallas as pl
from jax.experimental.pallas import tpu as pltpu


# ---------------------------------------------------------------------------
# Kernel
# ---------------------------------------------------------------------------

def _make_kernel(seq_len, block_s, tail_mask):
    """Build the mean-pool + fc kernel.  `tail_mask` (static Python bool)
    enables iota masking of the partial last sequence block when block_s does
    not divide seq_len."""

    def kernel(lhs_ref, mask_ref, cnt_ref, w_ref, b_ref, out_ref, acc_ref):
        # lhs_ref : (Bt, St, H)  last hidden states tile (bf16 or f32)
        # mask_ref: (Bt, St, 1)  attention mask tile (0/1, f32)
        # cnt_ref : (Bt, 1)      clamped valid-token count per row (f32)
        # w_ref   : (H, 2)       fc weight, already transposed to x @ W form
        # b_ref   : (1, 2)       fc bias
        # out_ref : (Bt, 2)      logits (written only on the last sequence step)
        # acc_ref : (Bt, H)      persistent f32 masked-sum accumulator
        si = pl.program_id(1)

        @pl.when(si == 0)
        def _init():
            acc_ref[...] = jnp.zeros_like(acc_ref)

        x = lhs_ref[...].astype(jnp.float32)           # (Bt, St, H)
        m = mask_ref[...].astype(jnp.float32)          # (Bt, St, 1)
        if tail_mask:
            pos = si * block_s + jax.lax.broadcasted_iota(jnp.int32, m.shape, 1)
            valid = pos < seq_len
            m = jnp.where(valid, m, 0.0)
            x = jnp.where(valid, x, 0.0)               # NaN-safe vs. garbage tail

        # Masked sum stays on the VPU: the kernel is HBM-bound on all current
        # generations.  (If profiling ever shows the VPU exposed, switch to a
        # batched dot_general over St so it runs on the idle MXU.)
        acc_ref[...] += jnp.sum(x * m, axis=1)         # (Bt, H), f32

        @pl.when(si == pl.num_programs(1) - 1)
        def _finalize():
            mean_emb = acc_ref[...] / cnt_ref[...]     # (Bt, H) / (Bt, 1)
            logits = jnp.dot(mean_emb, w_ref[...],
                             preferred_element_type=jnp.float32) + b_ref[...]
            out_ref[...] = logits.astype(out_ref.dtype)

    return kernel


# ---------------------------------------------------------------------------
# Generation-aware tiling
# ---------------------------------------------------------------------------

def _physical_vmem_bytes():
    try:
        return int(pltpu.get_tpu_info().vmem_capacity_bytes)
    except Exception:
        return 64 * 1024 * 1024      # conservative default: v7x per-TC VMEM


def _vmem_budget(lhs_itemsize):
    """VMEM limit + per-buffer budget for the lhs stream.

    Footprint accounting per lhs tile byte:
      2x  double-buffered input tiles (BlockSpec pipeline)
      2x  f32 upcast temporaries of the x.astype(f32) * m masked-sum body
    plus small slack for mask tiles, accumulator, weights and outputs.
    """
    phys = _physical_vmem_bytes()
    vmem_limit = min(phys * 3 // 4, 96 * 1024 * 1024)   # ~96 MiB v5e/v6e, ~48 MiB v7x
    upcast = max(4 // lhs_itemsize, 1)                   # 2 for bf16, 1 for f32
    slack = 4 * 1024 * 1024
    lhs_budget = max((vmem_limit - slack) // (2 + 2 * upcast), 1 * 1024 * 1024)
    return vmem_limit, lhs_budget


def _pick_block_b(B):
    # Sublane rule for the (Bt, 1)/(Bt, 2) blocks: Bt % 8 == 0 or Bt == B.
    # Keep Bt = 8 whenever that still yields >= 2 batch blocks so (a) block_s
    # (the contiguous-DMA dimension) gets the VMEM budget and (b) the
    # "parallel" batch axis shards across v7x's two TensorCores.
    if B % 8 == 0 and B >= 16:
        return 8
    return B


def _pick_block_s(S, block_b, H, itemsize, budget_bytes):
    """Returns (block_s, needs_tail_mask)."""
    bytes_per_s = block_b * H * itemsize
    cap = max(budget_bytes // max(bytes_per_s, 1), 1)
    if cap >= S:
        return S, False                                  # whole sequence per tile
    cap8 = max((cap // 8) * 8, 8)
    if S % 8 == 0:
        # Largest multiple-of-8 divisor of S within the cap; accept it only if
        # it is not tiny relative to the cap (otherwise the masked-tail path
        # wins on step count / DMA burst length).
        for cand in range(cap8, 7, -8):
            if S % cand == 0 and cand * 4 >= cap8:
                return cand, False
    return cap8, True                                    # cdiv grid + masked tail


def _grow_block_b(B, block_b, block_s, H, itemsize, budget_bytes):
    # Whole sequence already fits one tile: spend leftover budget on batch rows
    # to cut grid steps, but keep >= 2 batch blocks (v7x megacore) and divisibility.
    per_row = block_s * H * itemsize
    grown = block_b
    while (grown * 2 <= B // 2 and B % (grown * 2) == 0
           and (grown * 2) * per_row <= budget_bytes and grown * 2 <= 128):
        grown *= 2
    return grown


# ---------------------------------------------------------------------------
# Wrapper
# ---------------------------------------------------------------------------

def custom_model_head(last_hidden_state, attention_mask, fc_weight, fc_bias,
                      *, compute_dtype=jnp.bfloat16):
    """Masked mean pooling + Linear(hidden, 2), fused in one tiled Pallas kernel.

    `compute_dtype` is the transport dtype of the dominant (B, S, H) stream
    (bf16 halves HBM traffic); accumulation is always f32 in VMEM.
    """
    B, S, H = last_hidden_state.shape
    lhs = last_hidden_state
    if compute_dtype is not None and lhs.dtype != compute_dtype:
        lhs = lhs.astype(compute_dtype)
    itemsize = jnp.dtype(lhs.dtype).itemsize

    vmem_limit, lhs_budget = _vmem_budget(itemsize)
    block_b = _pick_block_b(B)
    block_s, tail = _pick_block_s(S, block_b, H, itemsize, lhs_budget)
    if (not tail) and block_s == S and block_b == 8:
        block_b = _grow_block_b(B, block_b, block_s, H, itemsize, lhs_budget)
    grid = (B // block_b, pl.cdiv(S, block_s))

    # Layout plumbing done once in the wrapper (not per grid step):
    mask3 = attention_mask.astype(jnp.float32).reshape(B, S, 1)          # (B, S, 1)
    cnt = jnp.maximum(jnp.sum(attention_mask.astype(jnp.float32), axis=1,
                              keepdims=True), 1e-9)                       # (B, 1)
    w_t = fc_weight.T.astype(jnp.float32)                                 # (H, 2)
    b = fc_bias.reshape(1, -1).astype(jnp.float32)                        # (1, 2)

    kernel = _make_kernel(S, block_s, tail)

    return pl.pallas_call(
        kernel,
        out_shape=jax.ShapeDtypeStruct((B, 2), jnp.float32),
        grid_spec=pltpu.PrefetchScalarGridSpec(
            num_scalar_prefetch=0,
            grid=grid,
            in_specs=[
                pl.BlockSpec((block_b, block_s, H), lambda bi, si: (bi, si, 0)),
                pl.BlockSpec((block_b, block_s, 1), lambda bi, si: (bi, si, 0)),
                pl.BlockSpec((block_b, 1), lambda bi, si: (bi, 0)),
                pl.BlockSpec((H, 2), lambda bi, si: (0, 0)),
                pl.BlockSpec((1, 2), lambda bi, si: (0, 0)),
            ],
            out_specs=pl.BlockSpec((block_b, 2), lambda bi, si: (bi, 0)),
            scratch_shapes=[pltpu.VMEM((block_b, H), jnp.float32)],
        ),
        compiler_params=pltpu.CompilerParams(
            dimension_semantics=("parallel", "arbitrary"),
            vmem_limit_bytes=int(vmem_limit),
        ),
    )(lhs, mask3, cnt, w_t, b)


def reference_head(last_hidden_state, attention_mask, fc_weight, fc_bias):
    """Pure-JAX reference matching the PyTorch MeanPooling + fc semantics."""
    m = attention_mask.astype(jnp.float32)[:, :, None]
    sum_emb = jnp.sum(last_hidden_state.astype(jnp.float32) * m, axis=1)
    sum_mask = jnp.maximum(jnp.sum(m, axis=1), 1e-9)
    mean_emb = sum_emb / sum_mask
    return mean_emb @ fc_weight.T.astype(jnp.float32) + fc_bias


if __name__ == "__main__":
    # Small shapes consistent with the forward pass.
    B, S, H = 2, 8, 32
    key = jax.random.PRNGKey(0)
    k_lhs, k_mask, k_w = jax.random.split(key, 3)

    last_hidden_state = jax.random.normal(k_lhs, (B, S, H), dtype=jnp.float32)

    # Attention mask: first row fully valid, second row padded at the tail.
    lengths = jnp.array([S, S // 2], dtype=jnp.int32)
    attention_mask = (jnp.arange(S)[None, :] < lengths[:, None]).astype(jnp.float32)

    # fc params per _init_weights: weight ~ N(0, initializer_range=0.02), bias = 0.
    fc_weight = 0.02 * jax.random.normal(k_w, (2, H), dtype=jnp.float32)
    fc_bias = jnp.zeros((2,), dtype=jnp.float32)

    out = custom_model_head(last_hidden_state, attention_mask, fc_weight, fc_bias)
    out = jax.block_until_ready(out)
    assert out.shape == (B, 2)

    # Primary check: exact semantics the kernel implements (bf16 transport,
    # f32 accumulate) against a pure-JAX reference on the bf16-rounded input.
    lhs_bf16 = last_hidden_state.astype(jnp.bfloat16).astype(jnp.float32)
    ref_bf16 = reference_head(lhs_bf16, attention_mask, fc_weight, fc_bias)
    assert jnp.allclose(out, ref_bf16, atol=1e-5, rtol=1e-5), (out, ref_bf16)

    # Sanity check against the full-f32 PyTorch-equivalent reference.
    ref_f32 = reference_head(last_hidden_state, attention_mask, fc_weight, fc_bias)
    assert jnp.allclose(out, ref_f32, atol=1e-2, rtol=1e-2), (out, ref_f32)

    print("KERNEL_OK")
</pallas_src>

<mosaic_0001>
module attributes {stable_mosaic.version = 11 : i64} {
  func.func @kernel(%arg0: i32, %arg1: i32, %arg2: memref<2x8x32xbf16, #tpu.memory_space<vmem>>, %arg3: memref<2x8x1xf32, #tpu.memory_space<vmem>>, %arg4: memref<2x1xf32, #tpu.memory_space<vmem>>, %arg5: memref<32x2xf32, #tpu.memory_space<vmem>>, %arg6: memref<1x2xf32, #tpu.memory_space<vmem>>, %arg7: memref<2x2xf32, #tpu.memory_space<vmem>>, %arg8: memref<2x32xf32, #tpu.memory_space<vmem>>) attributes {dimension_semantics = [#tpu.dimension_semantics<parallel>, #tpu.dimension_semantics<arbitrary>], iteration_bounds = array<i64: 1, 1>, scalar_prefetch = 0 : i64, scratch_operands = 1 : i64, tpu.core_type = #tpu.core_type<tc>, window_params = [{transform_indices = @transform_0, window_bounds = array<i64: 2, 8, 32>}, {transform_indices = @transform_1, window_bounds = array<i64: 2, 8, 1>}, {transform_indices = @transform_2, window_bounds = array<i64: 2, 1>}, {pipeline_mode = #tpu.pipeline_mode<synchronous>, transform_indices = @transform_3, window_bounds = array<i64: 32, 2>}, {pipeline_mode = #tpu.pipeline_mode<synchronous>, transform_indices = @transform_4, window_bounds = array<i64: 1, 2>}, {transform_indices = @transform_5, window_bounds = array<i64: 2, 2>}]} {
    %c0_i32 = arith.constant 0 : i32
    %0 = arith.cmpi eq, %arg1, %c0_i32 : i32
    %1 = arith.extui %0 : i1 to i32
    %c0_i32_0 = arith.constant 0 : i32
    %2 = arith.cmpi ne, %1, %c0_i32_0 : i32
    scf.if %2 {
      %cst_12 = arith.constant 0.000000e+00 : f32
      %15 = vector.broadcast %cst_12 : f32 to vector<2x32xf32>
      %c0_13 = arith.constant 0 : index
      %c0_14 = arith.constant 0 : index
      %16 = vector.load %arg8[%c0_13, %c0_14] : memref<2x32xf32, #tpu.memory_space<vmem>>, vector<2x32xf32>
      tpu.vector_store %arg8[%c0_13, %c0_14], %15 {strides = array<i32>} : memref<2x32xf32, #tpu.memory_space<vmem>>, vector<2x32xf32>,
    } else {
    }
    %c0 = arith.constant 0 : index
    %c0_1 = arith.constant 0 : index
    %c0_2 = arith.constant 0 : index
    %3 = vector.load %arg2[%c0, %c0_1, %c0_2] : memref<2x8x32xbf16, #tpu.memory_space<vmem>>, vector<2x8x32xbf16>
    %4 = arith.extf %3 : vector<2x8x32xbf16> to vector<2x8x32xf32>
    %c0_3 = arith.constant 0 : index
    %c0_4 = arith.constant 0 : index
    %c0_5 = arith.constant 0 : index
    %5 = vector.load %arg3[%c0_3, %c0_4, %c0_5] : memref<2x8x1xf32, #tpu.memory_space<vmem>>, vector<2x8x1xf32>
    %c0_6 = arith.constant 0 : index
    %c0_7 = arith.constant 0 : index
    %6 = vector.load %arg8[%c0_6, %c0_7] : memref<2x32xf32, #tpu.memory_space<vmem>>, vector<2x32xf32>
    %7 = vector.broadcast %5 : vector<2x8x1xf32> to vector<2x8x32xf32>
    %8 = arith.mulf %4, %7 : vector<2x8x32xf32>
    %cst = arith.constant dense<0.000000e+00> : vector<2x32xf32>
    %9 = vector.multi_reduction <add>, %8, %cst [1] : vector<2x8x32xf32> to vector<2x32xf32>
    %10 = arith.addf %6, %9 : vector<2x32xf32>
    %c0_8 = arith.constant 0 : index
    %c0_9 = arith.constant 0 : index
    %11 = vector.load %arg8[%c0_8, %c0_9] : memref<2x32xf32, #tpu.memory_space<vmem>>, vector<2x32xf32>
    tpu.vector_store %arg8[%c0_8, %c0_9], %10 {strides = array<i32>} : memref<2x32xf32, #tpu.memory_space<vmem>>, vector<2x32xf32>,
    %c0_i32_10 = arith.constant 0 : i32
    %12 = arith.cmpi eq, %arg1, %c0_i32_10 : i32
    %13 = arith.extui %12 : i1 to i32
    %c0_i32_11 = arith.constant 0 : i32
    %14 = arith.cmpi ne, %13, %c0_i32_11 : i32
    scf.if %14 {
      %c0_12 = arith.constant 0 : index
      %c0_13 = arith.constant 0 : index
      %15 = vector.load %arg8[%c0_12, %c0_13] : memref<2x32xf32, #tpu.memory_space<vmem>>, vector<2x32xf32>
      %c0_14 = arith.constant 0 : index
      %c0_15 = arith.constant 0 : index
      %16 = vector.load %arg4[%c0_14, %c0_15] : memref<2x1xf32, #tpu.memory_space<vmem>>, vector<2x1xf32>
      %17 = vector.broadcast %16 : vector<2x1xf32> to vector<2x32xf32>
      %18 = arith.divf %15, %17 : vector<2x32xf32>
      %c0_16 = arith.constant 0 : index
      %c0_17 = arith.constant 0 : index
      %19 = vector.load %arg5[%c0_16, %c0_17] : memref<32x2xf32, #tpu.memory_space<vmem>>, vector<32x2xf32>
      %cst_18 = arith.constant dense<0.000000e+00> : vector<2x2xf32>
      %20 = tpu.matmul %18, %19, %cst_18 {dimension_numbers = #tpu.dot_dimension_numbers<[1], [0], [0], [1], [0, 0, 1, 1], [], []>} : vector<2x32xf32>, vector<32x2xf32>, vector<2x2xf32> -> vector<2x2xf32>
      %c0_19 = arith.constant 0 : index
      %c0_20 = arith.constant 0 : index
      %21 = vector.load %arg6[%c0_19, %c0_20] : memref<1x2xf32, #tpu.memory_space<vmem>>, vector<1x2xf32>
      %22 = vector.broadcast %21 : vector<1x2xf32> to vector<2x2xf32>
      %23 = arith.addf %20, %22 : vector<2x2xf32>
      %c0_21 = arith.constant 0 : index
      %c0_22 = arith.constant 0 : index
      %24 = vector.load %arg7[%c0_21, %c0_22] : memref<2x2xf32, #tpu.memory_space<vmem>>, vector<2x2xf32>
      tpu.vector_store %arg7[%c0_21, %c0_22], %23 {strides = array<i32>} : memref<2x2xf32, #tpu.memory_space<vmem>>, vector<2x2xf32>,
    } else {
    }
    return
  }
  func.func @transform_0(%arg0: i32, %arg1: i32) -> (i32, i32, i32) {
    %c0_i32 = arith.constant 0 : i32
    %c0_i32_0 = arith.constant 0 : i32
    return %arg0, %arg1, %c0_i32 : i32, i32, i32
  }
  func.func @transform_1(%arg0: i32, %arg1: i32) -> (i32, i32, i32) {
    %c0_i32 = arith.constant 0 : i32
    %c0_i32_0 = arith.constant 0 : i32
    return %arg0, %arg1, %c0_i32 : i32, i32, i32
  }
  func.func @transform_2(%arg0: i32, %arg1: i32) -> (i32, i32) {
    %c0_i32 = arith.constant 0 : i32
    %c0_i32_0 = arith.constant 0 : i32
    return %arg0, %c0_i32 : i32, i32
  }
  func.func @transform_3(%arg0: i32, %arg1: i32) -> (i32, i32) {
    %c0_i32 = arith.constant 0 : i32
    %c0_i32_0 = arith.constant 0 : i32
    %c0_i32_1 = arith.constant 0 : i32
    return %c0_i32, %c0_i32_0 : i32, i32
  }
  func.func @transform_4(%arg0: i32, %arg1: i32) -> (i32, i32) {
    %c0_i32 = arith.constant 0 : i32
    %c0_i32_0 = arith.constant 0 : i32
    %c0_i32_1 = arith.constant 0 : i32
    return %c0_i32, %c0_i32_0 : i32, i32
  }
  func.func @transform_5(%arg0: i32, %arg1: i32) -> (i32, i32) {
    %c0_i32 = arith.constant 0 : i32
    %c0_i32_0 = arith.constant 0 : i32
    return %arg0, %c0_i32 : i32, i32
  }
}

</mosaic_0001>

<bundles_post_ra>
// kernel: tpu_custom_call.1
= control target key start
LH: loop header
LB: loop body
LE: loop exit
PB: predicated region body
PF: predicated region fallthrough
CT: control target
= control target key end

     0   :  { %v242_v2 = vmov 0   ;;  %s321_s0 = inlined_call_operand.vmem [shape: bf16[2,8,32], index: 0, kind: input, shape index: {}]   ;;  %s322_s1 = inlined_call_operand.vmem [shape: f32[2,8,1], index: 1, kind: input, shape index: {}]   ;;  %s323_s2 = inlined_call_operand.vmem [shape: f32[2,1], index: 2, kind: input, shape index: {}]   ;;  %s324_s3 = inlined_call_operand.vmem [shape: f32[32,2], index: 3, kind: input, shape index: {}]   ;;  %s325_s4 = inlined_call_operand.vmem [shape: f32[1,2], index: 4, kind: input, shape index: {}]   ;;  %s326_s5 = inlined_call_operand.hbm [shape: f32[2,2], index: 5, kind: output, shape index: {}]  }
   0x1   :  { %v31_v0 = vld [vmem:[%s322_s1] sm:$0xff]  ;;  %214 = vset.pattern.permute.xlu0 %v242_v2  ;;  %215 = vset.pattern.permute.xlu1 %v242_v2 }
   0x2   :  { %v73_v1 = vld [vmem:[%s323_s2] sm:$0x3] }
   0x3   :  { %10 = vsyncpa [#allocation4], 0  ;;  %36 = vperm.xlu0 %214, %v31_v0   ;;  %76 = vperm.xlu1 %215, %v73_v1   ;;  %v32_v3 = vld [vmem:[%s322_s1 + $0x8] sm:$0xff]  ;;  %vm25_vm0 = vcmask 254976   ;;  %v243_v4 = vmov 0.0   ;;  %v81_v5 = vld [vmem:[%s324_s3] sm:$0xff] }
   0x4   :  { %26 = vst.msk [vmem:[#allocation2] sm:$0x3] %vm25_vm0, %v243_v4  ;;  %v82_v6 = vld [vmem:[%s324_s3 + $0x8] sm:$0xff]  ;;  %v83_v7 = vld [vmem:[%s324_s3 + $0x10] sm:$0xff]  ;;  %v244_v8 = vmov 0.0|0.0   ;;  %v84_v10 = vld [vmem:[%s324_s3 + $0x18] sm:$0xff] }
   0x5   :  { %203 = vmatprep.subr.bf16.mxu0 %v244_v8  ;;  %v204_v9 = vpack.c.bf16 %v82_v6, %v81_v5  ;;  %v207_v11 = vpack.c.bf16 %v84_v10, %v83_v7  ;;  %vm245_vm1 = vmmov 0   ;;  %v184_v12 = vld [vmem:[%s321_s0] sm:$0xff]   ;;  %vm46_vm2 = vcmask 261120   ;;  %s246_s7 = smov [#allocation3]  }
   0x6   :  { %200 = vmatprep.mubr.msk.f32.mxu0 %vm245_vm1, %v243_v4  ;;  %v185_v13 = vunpack.c.l.bf16 %v184_v12  ;;  %v186_v16 = vunpack.c.h.bf16 %v184_v12  ;;  %vm63_vm3 = vcmask 1041409   ;;  %v181_v40 = vld [vmem:[%s325_s4] ss:$0 sm:$0xff]  ;;  %s173_s8 = sshll.u32 %s246_s7, 4  ;;  %vm165_vm4 = vcmask 9216   ;;  %s174_s8 = int_to_ptr.vmem [resolvable:$true] %s173_s8 }
   0x7   :  { %41 = vperm.xlu0 %214, %v32_v3   ;;  %205 = vmatpush3.bf16.msra.mxu0 %v204_v9  ;;  %s218_s9 = scalar_lea.vmem %s174_s8, 32  ;;  %p223_p1 = scmp.lt.s32.totalorder %s174_s8, %s174_s8 }
   0x8   :  { %206 = vmatprep.subr.bf16.mxu0 %v244_v8  ;;  %p219_p0 = scmp.ne.s32.totalorder %s174_s8, %s218_s9  ;;  %p224_p2 = scmp.lt.s32.totalorder %s218_s9, %s218_s9 }
   0xa   :  { %p225_p3 = por %p224_p2, %p223_p1 }
   0xb   :  { %208 = vmatpush3.bf16.msra.mxu0 %v207_v11  ;;  %v33_v34 = vld [vmem:[#allocation2] sm:$0x3] }
   0xc   :  { %p226_p4 = pnand %p225_p3, %p219_p0 }
  0x82   :  { %v37_v14 = vpop.permute.xlu0 %36  ;;  %v77_v30 = vpop.permute.xlu1 %76 }
  0x83   :  { %v44_v15 = vmul.f32 %v185_v13, %v37_v14  ;;  %216 = vrcp.f32 %v77_v30 }
  0x85   :  { %v47_v17 = vsel %vm46_vm2, %v44_v15, 0.0 }
  0x86   :  { %v48_v18 = vrot.slane %v47_v17, 4  ;;  %v42_v19 = vpop.permute.xlu0 %41 }
  0x87   :  { %v45_v20 = vmul.f32 %v186_v16, %v42_v19 }
  0x88   :  { %v49_v21 = vadd.f32 %v48_v18, %v47_v17 }
  0x89   :  { %v54_v22 = vsel %vm46_vm2, %v45_v20, 0.0 }
  0x8a   :  { %v50_v23 = vrot.slane %v49_v21, 2  ;;  %v55_v24 = vrot.slane %v54_v22, 4 }
  0x8c   :  { %v51_v25 = vadd.f32 %v50_v23, %v49_v21  ;;  %v56_v26 = vadd.f32 %v55_v24, %v54_v22 }
  0x8d   :  { %v217_v37 = vpop.eup %216 }
  0x8e   :  { %v57_v27 = vrot.slane %v56_v26, 2  ;;  %v52_v28 = vrot.slane %v51_v25, 1 }
  0x90   :  { %v58_v29 = vadd.f32 %v57_v27, %v56_v26  ;;  %v53_v32 = vadd.f32 %v52_v28, %v51_v25 }
  0x92   :  { %v59_v31 = vrot.slane %v58_v29, 1 }
  0x94   :  { %v60_v33 = vadd.f32 %v59_v31, %v58_v29 }
  0x96   :  { %v64_v35 = vsel %vm63_vm3, %v60_v33, %v53_v32 }
  0x97   :  { %v66_v36 = vadd.f32 %v64_v35, %v33_v34 }
  0x99   :  { %68 = vst.msk [vmem:[#allocation2] sm:$0x3] %vm25_vm0, %v66_v36 }
  0xa0   :  { %v72_v38 = vld [vmem:[#allocation2] sm:$0x3] }
  0xa1   :  { %v80_v39 = vmul.f32 %v217_v37, %v72_v38 }
  0xa3   :  { %201 = vmatmul.mubr.msk.f32.vlgmr.msra.gmra.mrb[0].mxu0 %vm46_vm2, %v80_v39 }
 0x176   :  { %v161_v41 = vpop.f32.mrb[0].mxu0 }
 0x177   :  { %v162_v42 = vadd.f32 %v181_v40, %v161_v41  ;;  %v202_v43 = vpop.f32.mrb[1].mxu0 }
 0x179   :  { %166 = vst.msk [vmem:[#allocation3] sm:$0x3] %vm165_vm4, %v162_v42 }
 0x17a   :  { %229 = shalt.err (!%p226_p4)
}
 0x17b   :  { %s230_s12 = scalar_lea.hbm %s326_s5, 32 }
 0x17c   :  { %p231_p5 = scmp.ne.s32.totalorder %s326_s5, %s230_s12  ;;  %p234_p6 = scmp.lt.u32.totalorder %s230_s12, %s326_s5 }
 0x17e   :  { %p236_p7 = pnand %p234_p6, %p231_p5 }
 0x180   :  { %239 = shalt.err (!%p236_p7)
}
 0x181   :  { %176 = dma.vmem_to_hbm [thread:$0]  %s174_s8, 32, %s326_s5, [#allocation4]  }
 0x182   :  { %240 = dma.done.wait [#allocation4], 32  }
 0x183   :  { %241 = vsyncadd [#allocation4], 4294967264 }
 0x184   :  { %180 = vsyncpa [#allocation4], 1 }

</bundles_post_ra>
